<compile_context>
chip_gen: v7x
topology: tpu7x:2x2x1
jax: 0.10.0
libtpu: 0.0.40
codegen_flags: <defaults>
</compile_context>

<pallas_src>
import jax
import jax.numpy as jnp
from jax.experimental import pallas as pl
from jax.experimental.pallas import tpu as pltpu


def _upsample_conv_kernel(xpad_ref, e_ref, b_ref, out_ref):
    """Fused nearest-x2 upsample + 3x3 conv (padding=1), phases fused into matmul N.

    xpad_ref: (1, H+4, W, Cin)        NHWC input, H zero-padded by 2 on each side, full height
    e_ref:    (9, Cin, 4*Cout)        folded taps; tap = r*3 + s, column = a*2*Cout + b*Cout + c
    b_ref:    (1, 2*Cout)             bias replicated for b=0,1
    out_ref:  (1, TILE_H, 2, W, 2*Cout)
              out[0, i, a, j, b*Cout + c] == y[2*(h*TILE_H + i) + a, 2*j + b, c]
    """
    tile_h = out_ref.shape[1]
    w = out_ref.shape[3]
    c2 = out_ref.shape[4]            # 2 * Cout
    cin = xpad_ref.shape[3]
    n4c = e_ref.shape[2]             # 4 * Cout
    np2 = (tile_h + 2) * w
    nt = tile_h * w

    h = pl.program_id(1)
    row0 = pl.multiple_of(h * tile_h, tile_h)
    xs = xpad_ref[0, pl.ds(row0, tile_h + 4), :, :]          # (tile_h+4, W, Cin)
    xf = xs.reshape((tile_h + 4) * w, cin)                   # W % 8 == 0 -> relayout-free

    # Three horizontally shifted variants (s = -1, 0, +1), built once per grid step.
    col = jax.lax.broadcasted_iota(jnp.int32, (tile_h + 2, w, cin), 1).reshape(np2, cin)
    zero = jnp.zeros((), xf.dtype)
    s_m = jnp.where(col == 0, zero, xf[w - 1:w - 1 + np2, :])       # shift -1, mask col 0
    s_0 = xf[w:w + np2, :]                                          # shift  0 (aligned view)
    s_p = jnp.where(col == w - 1, zero, xf[w + 1:w + 1 + np2, :])   # shift +1, mask col W-1
    shifted = (s_m, s_0, s_p)

    # 9 taps, phases fused in the N dimension of the matmul.
    acc = jnp.zeros((nt, n4c), jnp.float32)
    for r in range(3):
        base = r * w                                         # multiple of 8 when W % 8 == 0
        for si in range(3):
            acc = acc + jnp.dot(
                shifted[si][base:base + nt, :],
                e_ref[r * 3 + si],
                preferred_element_type=jnp.float32,
            )

    bias = b_ref[...].astype(jnp.float32)                    # (1, 2*Cout)
    for a in range(2):
        blk = acc[:, a * c2:(a + 1) * c2] + bias             # (nt, 2*Cout), f32
        out_ref[0, :, a, :, :] = blk.reshape(tile_h, w, c2).astype(out_ref.dtype)


def _fold_nearest_up2_into_conv3x3(w):
    """Fold nearest x2 upsampling into the 3x3 conv weights, phase-fused layout.

    w: (Cout, Cin, 3, 3) OIHW.  Returns E of shape (9, Cin, 4*Cout) such that, with x_h1 the
    1-row zero-padded (H only) original-resolution NHWC input and s = s_idx - 1,
        y[2i+a, 2j+b, c] = bias[c]
            + sum_{r, s_idx} x_h1[i + r, j + s, :] @ E[r*3 + s_idx, :, a*2*Cout + b*Cout + c]
    (columns j+s outside [0, W) contribute zero).
    """
    cout, cin = w.shape[0], w.shape[1]
    wt = jnp.transpose(w, (2, 3, 1, 0))          # (ky, kx, Cin, Cout)
    tap_map = ((0, 1, 1), (1, 1, 2))
    e = jnp.zeros((3, 3, cin, 2, 2, cout), w.dtype)
    for a in range(2):
        for b in range(2):
            for ky in range(3):
                for kx in range(3):
                    r = tap_map[a][ky]
                    s = tap_map[b][kx]
                    e = e.at[r, s, :, a, b, :].add(wt[ky, kx])
    return e.reshape(9, cin, 4 * cout)


def _choose_tile_h(height):
    """Largest divisor of H that is <= 8 rows (bounds the f32 accumulator / output block)."""
    for t in (8, 4, 2, 1):
        if height % t == 0:
            return t
    return 1


@jax.jit
def upsample_forward(x, w, b):
    """Pallas equivalent of Upsample(channels, use_conv=True, dims=2).forward.

    x: (B, Cin, H, W) NCHW; w: (Cout, Cin, 3, 3); b: (Cout,) -> (B, Cout, 2H, 2W) NCHW.
    """
    B, Cin, H, W = x.shape
    Cout = w.shape[0]
    dt = x.dtype

    x_nhwc = jnp.transpose(x, (0, 2, 3, 1))                      # NHWC, keep caller dtype
    xpad = jnp.pad(x_nhwc, ((0, 0), (2, 2), (0, 0), (0, 0)))     # (B, H+4, W, Cin), H-pad only
    E = _fold_nearest_up2_into_conv3x3(w.astype(jnp.float32)).astype(dt)   # (9, Cin, 4*Cout)
    bias2 = jnp.concatenate([b, b]).astype(jnp.float32)[None, :]           # (1, 2*Cout)

    tile_h = _choose_tile_h(H)
    n_h = H // tile_h
    c2 = 2 * Cout

    out5 = pl.pallas_call(
        _upsample_conv_kernel,
        out_shape=jax.ShapeDtypeStruct((B, H, 2, W, c2), dt),
        grid_spec=pltpu.PrefetchScalarGridSpec(
            num_scalar_prefetch=0,
            grid=(B, n_h),
            in_specs=[
                pl.BlockSpec((1, H + 4, W, Cin), lambda n, h: (n, 0, 0, 0)),
                pl.BlockSpec((9, Cin, 4 * Cout), lambda n, h: (0, 0, 0)),
                pl.BlockSpec((1, c2), lambda n, h: (0, 0)),
            ],
            out_specs=pl.BlockSpec((1, tile_h, 2, W, c2), lambda n, h: (n, h, 0, 0, 0)),
        ),
        compiler_params=pltpu.CompilerParams(
            dimension_semantics=("parallel", "parallel"),
            vmem_limit_bytes=48 * 1024 * 1024,
        ),
    )(xpad, E, bias2)

    # Phase interleave is now a pure reshape: (B, H, 2, W, 2*Cout) -> (B, 2H, 2W, Cout).
    y_nhwc = out5.reshape(B, 2 * H, 2 * W, Cout)
    return jnp.transpose(y_nhwc, (0, 3, 1, 2))                   # back to NCHW (module API)


def _reference_forward(x, w, b):
    """Pure-JAX reference matching the PyTorch module (nearest x2, then Conv2d(k=3, pad=1))."""
    up = jnp.repeat(jnp.repeat(x, 2, axis=2), 2, axis=3)
    y = jax.lax.conv_general_dilated(
        up, w, window_strides=(1, 1), padding=((1, 1), (1, 1)),
        dimension_numbers=("NCHW", "OIHW", "NCHW"),
    )
    return y + b[None, :, None, None]


if __name__ == "__main__":
    # Module config: Upsample(channels=4, use_conv=True, dims=2) -> out_channels=4
    B, C, H, W = 2, 4, 16, 16
    Cout = C

    key = jax.random.PRNGKey(0)
    kx, kw, kb = jax.random.split(key, 3)
    x = jax.random.normal(kx, (B, C, H, W), dtype=jnp.float32)
    conv_w = 0.1 * jax.random.normal(kw, (Cout, C, 3, 3), dtype=jnp.float32)
    conv_b = 0.05 * jax.random.normal(kb, (Cout,), dtype=jnp.float32)

    y = upsample_forward(x, conv_w, conv_b)
    y = jax.block_until_ready(y)

    assert y.shape == (B, Cout, 2 * H, 2 * W), y.shape

    y_ref = jax.block_until_ready(_reference_forward(x, conv_w, conv_b))
    assert jnp.allclose(y, y_ref, atol=1e-4, rtol=1e-3), (
        float(jnp.max(jnp.abs(y - y_ref)))
    )

    print("KERNEL_OK")
</pallas_src>

<mosaic_0001>
module attributes {stable_mosaic.version = 11 : i64} {
  func.func @_upsample_conv_kernel(%arg0: i32, %arg1: i32, %arg2: memref<1x20x16x4xf32, #tpu.memory_space<vmem>>, %arg3: memref<9x4x16xf32, #tpu.memory_space<vmem>>, %arg4: memref<1x8xf32, #tpu.memory_space<vmem>>, %arg5: memref<1x8x2x16x8xf32, #tpu.memory_space<vmem>>) attributes {dimension_semantics = [#tpu.dimension_semantics<parallel>, #tpu.dimension_semantics<parallel>], iteration_bounds = array<i64: 2, 2>, scalar_prefetch = 0 : i64, scratch_operands = 0 : i64, tpu.core_type = #tpu.core_type<tc>, window_params = [{transform_indices = @transform_0, window_bounds = array<i64: 1, 20, 16, 4>}, {pipeline_mode = #tpu.pipeline_mode<synchronous>, transform_indices = @transform_1, window_bounds = array<i64: 9, 4, 16>}, {pipeline_mode = #tpu.pipeline_mode<synchronous>, transform_indices = @transform_2, window_bounds = array<i64: 1, 8>}, {transform_indices = @transform_3, window_bounds = array<i64: 1, 8, 2, 16, 8>}]} {
    %c8_i32 = arith.constant 8 : i32
    %0 = arith.muli %arg1, %c8_i32 : i32
    %1 = tpu.assume_multiple %0, 8 : i32
    %c0 = arith.constant 0 : index
    %2 = arith.index_cast %1 : i32 to index
    %c0_0 = arith.constant 0 : index
    %c0_1 = arith.constant 0 : index
    %3 = vector.load %arg2[%c0, %2, %c0_0, %c0_1] : memref<1x20x16x4xf32, #tpu.memory_space<vmem>>, vector<1x12x16x4xf32>
    %4 = vector.shape_cast %3 : vector<1x12x16x4xf32> to vector<12x16x4xf32>
    %5 = vector.shape_cast %4 : vector<12x16x4xf32> to vector<192x4xf32>
    %6 = tpu.iota {dimensions = array<i32: 1>} : vector<10x16x4xi32>
    %7 = vector.shape_cast %6 : vector<10x16x4xi32> to vector<160x4xi32>
    %c0_i32 = arith.constant 0 : i32
    %8 = vector.broadcast %c0_i32 : i32 to vector<160x4xi32>
    %9 = arith.cmpi eq, %7, %8 : vector<160x4xi32>
    %10 = vector.extract_strided_slice %5 {offsets = [15, 0], sizes = [160, 4], strides = [1, 1]} : vector<192x4xf32> to vector<160x4xf32>
    %cst = arith.constant 0.000000e+00 : f32
    %11 = vector.broadcast %cst : f32 to vector<160x4xf32>
    %12 = arith.select %9, %11, %10 : vector<160x4xi1>, vector<160x4xf32>
    %13 = vector.extract_strided_slice %5 {offsets = [16, 0], sizes = [160, 4], strides = [1, 1]} : vector<192x4xf32> to vector<160x4xf32>
    %c15_i32 = arith.constant 15 : i32
    %14 = vector.broadcast %c15_i32 : i32 to vector<160x4xi32>
    %15 = arith.cmpi eq, %7, %14 : vector<160x4xi32>
    %16 = vector.extract_strided_slice %5 {offsets = [17, 0], sizes = [160, 4], strides = [1, 1]} : vector<192x4xf32> to vector<160x4xf32>
    %cst_2 = arith.constant 0.000000e+00 : f32
    %17 = vector.broadcast %cst_2 : f32 to vector<160x4xf32>
    %18 = arith.select %15, %17, %16 : vector<160x4xi1>, vector<160x4xf32>
    %cst_3 = arith.constant 0.000000e+00 : f32
    %19 = vector.broadcast %cst_3 : f32 to vector<128x16xf32>
    %20 = vector.extract_strided_slice %12 {offsets = [0, 0], sizes = [128, 4], strides = [1, 1]} : vector<160x4xf32> to vector<128x4xf32>
    %c0_4 = arith.constant 0 : index
    %c0_5 = arith.constant 0 : index
    %c0_6 = arith.constant 0 : index
    %21 = vector.load %arg3[%c0_4, %c0_5, %c0_6] : memref<9x4x16xf32, #tpu.memory_space<vmem>>, vector<1x4x16xf32>
    %22 = vector.shape_cast %21 : vector<1x4x16xf32> to vector<4x16xf32>
    %cst_7 = arith.constant dense<0.000000e+00> : vector<128x16xf32>
    %23 = tpu.matmul %20, %22, %cst_7 {dimension_numbers = #tpu.dot_dimension_numbers<[1], [0], [0], [1], [0, 0, 1, 1], [], []>} : vector<128x4xf32>, vector<4x16xf32>, vector<128x16xf32> -> vector<128x16xf32>
    %24 = arith.addf %19, %23 : vector<128x16xf32>
    %25 = vector.extract_strided_slice %13 {offsets = [0, 0], sizes = [128, 4], strides = [1, 1]} : vector<160x4xf32> to vector<128x4xf32>
    %c1 = arith.constant 1 : index
    %c0_8 = arith.constant 0 : index
    %c0_9 = arith.constant 0 : index
    %26 = vector.load %arg3[%c1, %c0_8, %c0_9] : memref<9x4x16xf32, #tpu.memory_space<vmem>>, vector<1x4x16xf32>
    %27 = vector.shape_cast %26 : vector<1x4x16xf32> to vector<4x16xf32>
    %cst_10 = arith.constant dense<0.000000e+00> : vector<128x16xf32>
    %28 = tpu.matmul %25, %27, %cst_10 {dimension_numbers = #tpu.dot_dimension_numbers<[1], [0], [0], [1], [0, 0, 1, 1], [], []>} : vector<128x4xf32>, vector<4x16xf32>, vector<128x16xf32> -> vector<128x16xf32>
    %29 = arith.addf %24, %28 : vector<128x16xf32>
    %30 = vector.extract_strided_slice %18 {offsets = [0, 0], sizes = [128, 4], strides = [1, 1]} : vector<160x4xf32> to vector<128x4xf32>
    %c2 = arith.constant 2 : index
    %c0_11 = arith.constant 0 : index
    %c0_12 = arith.constant 0 : index
    %31 = vector.load %arg3[%c2, %c0_11, %c0_12] : memref<9x4x16xf32, #tpu.memory_space<vmem>>, vector<1x4x16xf32>
    %32 = vector.shape_cast %31 : vector<1x4x16xf32> to vector<4x16xf32>
    %cst_13 = arith.constant dense<0.000000e+00> : vector<128x16xf32>
    %33 = tpu.matmul %30, %32, %cst_13 {dimension_numbers = #tpu.dot_dimension_numbers<[1], [0], [0], [1], [0, 0, 1, 1], [], []>} : vector<128x4xf32>, vector<4x16xf32>, vector<128x16xf32> -> vector<128x16xf32>
    %34 = arith.addf %29, %33 : vector<128x16xf32>
    %35 = vector.extract_strided_slice %12 {offsets = [16, 0], sizes = [128, 4], strides = [1, 1]} : vector<160x4xf32> to vector<128x4xf32>
    %c3 = arith.constant 3 : index
    %c0_14 = arith.constant 0 : index
    %c0_15 = arith.constant 0 : index
    %36 = vector.load %arg3[%c3, %c0_14, %c0_15] : memref<9x4x16xf32, #tpu.memory_space<vmem>>, vector<1x4x16xf32>
    %37 = vector.shape_cast %36 : vector<1x4x16xf32> to vector<4x16xf32>
    %cst_16 = arith.constant dense<0.000000e+00> : vector<128x16xf32>
    %38 = tpu.matmul %35, %37, %cst_16 {dimension_numbers = #tpu.dot_dimension_numbers<[1], [0], [0], [1], [0, 0, 1, 1], [], []>} : vector<128x4xf32>, vector<4x16xf32>, vector<128x16xf32> -> vector<128x16xf32>
    %39 = arith.addf %34, %38 : vector<128x16xf32>
    %40 = vector.extract_strided_slice %13 {offsets = [16, 0], sizes = [128, 4], strides = [1, 1]} : vector<160x4xf32> to vector<128x4xf32>
    %c4 = arith.constant 4 : index
    %c0_17 = arith.constant 0 : index
    %c0_18 = arith.constant 0 : index
    %41 = vector.load %arg3[%c4, %c0_17, %c0_18] : memref<9x4x16xf32, #tpu.memory_space<vmem>>, vector<1x4x16xf32>
    %42 = vector.shape_cast %41 : vector<1x4x16xf32> to vector<4x16xf32>
    %cst_19 = arith.constant dense<0.000000e+00> : vector<128x16xf32>
    %43 = tpu.matmul %40, %42, %cst_19 {dimension_numbers = #tpu.dot_dimension_numbers<[1], [0], [0], [1], [0, 0, 1, 1], [], []>} : vector<128x4xf32>, vector<4x16xf32>, vector<128x16xf32> -> vector<128x16xf32>
    %44 = arith.addf %39, %43 : vector<128x16xf32>
    %45 = vector.extract_strided_slice %18 {offsets = [16, 0], sizes = [128, 4], strides = [1, 1]} : vector<160x4xf32> to vector<128x4xf32>
    %c5 = arith.constant 5 : index
    %c0_20 = arith.constant 0 : index
    %c0_21 = arith.constant 0 : index
    %46 = vector.load %arg3[%c5, %c0_20, %c0_21] : memref<9x4x16xf32, #tpu.memory_space<vmem>>, vector<1x4x16xf32>
    %47 = vector.shape_cast %46 : vector<1x4x16xf32> to vector<4x16xf32>
    %cst_22 = arith.constant dense<0.000000e+00> : vector<128x16xf32>
    %48 = tpu.matmul %45, %47, %cst_22 {dimension_numbers = #tpu.dot_dimension_numbers<[1], [0], [0], [1], [0, 0, 1, 1], [], []>} : vector<128x4xf32>, vector<4x16xf32>, vector<128x16xf32> -> vector<128x16xf32>
    %49 = arith.addf %44, %48 : vector<128x16xf32>
    %50 = vector.extract_strided_slice %12 {offsets = [32, 0], sizes = [128, 4], strides = [1, 1]} : vector<160x4xf32> to vector<128x4xf32>
    %c6 = arith.constant 6 : index
    %c0_23 = arith.constant 0 : index
    %c0_24 = arith.constant 0 : index
    %51 = vector.load %arg3[%c6, %c0_23, %c0_24] : memref<9x4x16xf32, #tpu.memory_space<vmem>>, vector<1x4x16xf32>
    %52 = vector.shape_cast %51 : vector<1x4x16xf32> to vector<4x16xf32>
    %cst_25 = arith.constant dense<0.000000e+00> : vector<128x16xf32>
    %53 = tpu.matmul %50, %52, %cst_25 {dimension_numbers = #tpu.dot_dimension_numbers<[1], [0], [0], [1], [0, 0, 1, 1], [], []>} : vector<128x4xf32>, vector<4x16xf32>, vector<128x16xf32> -> vector<128x16xf32>
    %54 = arith.addf %49, %53 : vector<128x16xf32>
    %55 = vector.extract_strided_slice %13 {offsets = [32, 0], sizes = [128, 4], strides = [1, 1]} : vector<160x4xf32> to vector<128x4xf32>
    %c7 = arith.constant 7 : index
    %c0_26 = arith.constant 0 : index
    %c0_27 = arith.constant 0 : index
    %56 = vector.load %arg3[%c7, %c0_26, %c0_27] : memref<9x4x16xf32, #tpu.memory_space<vmem>>, vector<1x4x16xf32>
    %57 = vector.shape_cast %56 : vector<1x4x16xf32> to vector<4x16xf32>
    %cst_28 = arith.constant dense<0.000000e+00> : vector<128x16xf32>
    %58 = tpu.matmul %55, %57, %cst_28 {dimension_numbers = #tpu.dot_dimension_numbers<[1], [0], [0], [1], [0, 0, 1, 1], [], []>} : vector<128x4xf32>, vector<4x16xf32>, vector<128x16xf32> -> vector<128x16xf32>
    %59 = arith.addf %54, %58 : vector<128x16xf32>
    %60 = vector.extract_strided_slice %18 {offsets = [32, 0], sizes = [128, 4], strides = [1, 1]} : vector<160x4xf32> to vector<128x4xf32>
    %c8 = arith.constant 8 : index
    %c0_29 = arith.constant 0 : index
    %c0_30 = arith.constant 0 : index
    %61 = vector.load %arg3[%c8, %c0_29, %c0_30] : memref<9x4x16xf32, #tpu.memory_space<vmem>>, vector<1x4x16xf32>
    %62 = vector.shape_cast %61 : vector<1x4x16xf32> to vector<4x16xf32>
    %cst_31 = arith.constant dense<0.000000e+00> : vector<128x16xf32>
    %63 = tpu.matmul %60, %62, %cst_31 {dimension_numbers = #tpu.dot_dimension_numbers<[1], [0], [0], [1], [0, 0, 1, 1], [], []>} : vector<128x4xf32>, vector<4x16xf32>, vector<128x16xf32> -> vector<128x16xf32>
    %64 = arith.addf %59, %63 : vector<128x16xf32>
    %c0_32 = arith.constant 0 : index
    %c0_33 = arith.constant 0 : index
    %65 = vector.load %arg4[%c0_32, %c0_33] : memref<1x8xf32, #tpu.memory_space<vmem>>, vector<1x8xf32>
    %66 = vector.extract_strided_slice %64 {offsets = [0, 0], sizes = [128, 8], strides = [1, 1]} : vector<128x16xf32> to vector<128x8xf32>
    %67 = vector.broadcast %65 : vector<1x8xf32> to vector<128x8xf32>
    %68 = arith.addf %66, %67 : vector<128x8xf32>
    %69 = vector.shape_cast %68 : vector<128x8xf32> to vector<8x16x8xf32>
    %c0_34 = arith.constant 0 : index
    %c0_35 = arith.constant 0 : index
    %c0_36 = arith.constant 0 : index
    %c0_37 = arith.constant 0 : index
    %c0_38 = arith.constant 0 : index
    %70 = vector.load %arg5[%c0_34, %c0_35, %c0_36, %c0_37, %c0_38] : memref<1x8x2x16x8xf32, #tpu.memory_space<vmem>>, vector<1x8x1x16x8xf32>
    %71 = vector.shape_cast %70 : vector<1x8x1x16x8xf32> to vector<8x16x8xf32>
    %72 = vector.shape_cast %69 : vector<8x16x8xf32> to vector<1x8x1x16x8xf32>
    tpu.vector_store %arg5[%c0_34, %c0_35, %c0_36, %c0_37, %c0_38], %72 {strides = array<i32>} : memref<1x8x2x16x8xf32, #tpu.memory_space<vmem>>, vector<1x8x1x16x8xf32>,
    %73 = vector.extract_strided_slice %64 {offsets = [0, 8], sizes = [128, 8], strides = [1, 1]} : vector<128x16xf32> to vector<128x8xf32>
    %74 = vector.broadcast %65 : vector<1x8xf32> to vector<128x8xf32>
    %75 = arith.addf %73, %74 : vector<128x8xf32>
    %76 = vector.shape_cast %75 : vector<128x8xf32> to vector<8x16x8xf32>
    %c0_39 = arith.constant 0 : index
    %c0_40 = arith.constant 0 : index
    %c1_41 = arith.constant 1 : index
    %c0_42 = arith.constant 0 : index
    %c0_43 = arith.constant 0 : index
    %77 = vector.load %arg5[%c0_39, %c0_40, %c1_41, %c0_42, %c0_43] : memref<1x8x2x16x8xf32, #tpu.memory_space<vmem>>, vector<1x8x1x16x8xf32>
    %78 = vector.shape_cast %77 : vector<1x8x1x16x8xf32> to vector<8x16x8xf32>
    %79 = vector.shape_cast %76 : vector<8x16x8xf32> to vector<1x8x1x16x8xf32>
    tpu.vector_store %arg5[%c0_39, %c0_40, %c1_41, %c0_42, %c0_43], %79 {strides = array<i32>} : memref<1x8x2x16x8xf32, #tpu.memory_space<vmem>>, vector<1x8x1x16x8xf32>,
    return
  }
  func.func @transform_0(%arg0: i32, %arg1: i32) -> (i32, i32, i32, i32) {
    %c0_i32 = arith.constant 0 : i32
    %c0_i32_0 = arith.constant 0 : i32
    %c0_i32_1 = arith.constant 0 : i32
    %c0_i32_2 = arith.constant 0 : i32
    return %arg0, %c0_i32, %c0_i32_0, %c0_i32_1 : i32, i32, i32, i32
  }
  func.func @transform_1(%arg0: i32, %arg1: i32) -> (i32, i32, i32) {
    %c0_i32 = arith.constant 0 : i32
    %c0_i32_0 = arith.constant 0 : i32
    %c0_i32_1 = arith.constant 0 : i32
    %c0_i32_2 = arith.constant 0 : i32
    return %c0_i32, %c0_i32_0, %c0_i32_1 : i32, i32, i32
  }
  func.func @transform_2(%arg0: i32, %arg1: i32) -> (i32, i32) {
    %c0_i32 = arith.constant 0 : i32
    %c0_i32_0 = arith.constant 0 : i32
    %c0_i32_1 = arith.constant 0 : i32
    return %c0_i32, %c0_i32_0 : i32, i32
  }
  func.func @transform_3(%arg0: i32, %arg1: i32) -> (i32, i32, i32, i32, i32) {
    %c0_i32 = arith.constant 0 : i32
    %c0_i32_0 = arith.constant 0 : i32
    %c0_i32_1 = arith.constant 0 : i32
    %c0_i32_2 = arith.constant 0 : i32
    return %arg0, %arg1, %c0_i32, %c0_i32_0, %c0_i32_1 : i32, i32, i32, i32, i32
  }
}

</mosaic_0001>

<bundles_post_ra>
// kernel: upsample_forward.1
= control target key start
LH: loop header
LB: loop body
LE: loop exit
PB: predicated region body
PF: predicated region fallthrough
CT: control target
= control target key end

     0   :  { %s3084_s12 = smov 0   ;;  %s3086_s13 = smov 0   ;;  %s3875_s0 = inlined_call_operand.vmem [shape: f32[2,20,16,4], index: 0, kind: input, shape index: {}]   ;;  %s3876_s1 = inlined_call_operand.vmem [shape: f32[9,4,16], index: 1, kind: input, shape index: {}]   ;;  %s3877_s2 = inlined_call_operand.vmem [shape: f32[1,8], index: 2, kind: input, shape index: {}]   ;;  %s3878_s3 = inlined_call_operand.vmem [shape: f32[2,16,2,16,8], index: 3, kind: output, shape index: {}]  }
   0x1   :  { %s3088_s14 = smov 0   ;;  %s3090_s15 = smov 0  }
   0x2   :  { %s3092_s16 = smov 0  }
   0x3 LB: > { %s22_s17 = sadd.s32 1, %s3052_s14  ;;  %s25_s18 = sadd.s32 1, %s3056_s15  ;;  %s3060_s16 = sphi %s3092_s16, %s13_s16   ;;  %s3056_s15 = sphi %s3090_s15, %s3882_s15   ;;  %s3052_s14 = sphi %s3088_s14, %s3881_s14   ;;  %s3048_s13 = sphi %s3086_s13, %s3880_s13   ;;  %s3044_s12 = sphi %s3084_s12, %s3879_s12  }
   0x4   : > { %p23_p0 = scmp.ge.s32.totalorder %s22_s17, 2  ;;  %p2273_p1 = scmp.ge.s32.totalorder %s3060_s16, 1 }
   0x5   : > { %p151_p2 = scmp.lt.s32.totalorder %s3060_s16, 5 }
   0x6   : > { %s3884_s17 = smov (%p23_p0, %s22_s17), 0  ;;  %s3886_s18 = smov (!%p23_p0, %s25_s18), %s3056_s15 }
   0x7   : > { %p152_p3 = pnand %p2273_p1, %p151_p2  ;;  %p27_p4 = scmp.ge.s32.totalorder %s3886_s18, 2 }
   0x8   : > { %v2281_v0 = vld [vmem:[%s3876_s1 + $0x4] sm:$0xf] (!%p152_p3)  ;;  %vm450_vm0 = vcmask (!%p152_p3), 1043456   ;;  %v3122_v1 = vld [vmem:[%s3876_s1 + $0x10] sm:$0xf] (!%p152_p3)  ;;  %p180_p5 = scmp.lt.s32.totalorder (!%p152_p3), %s3048_s13, 1  ;;  %v221_v4 = vlaneseq (!%p152_p3) }
   0x9   : > { %s3888_s18 = smov (%p27_p4, %s3886_s18), 0  ;;  %155 = sbr.rel (%p152_p3) target bundleno = 496 (0x1f0), region = 32 }
   0xa   : > { %2615 = vmatprep.subr.msk.mxu1 (!%p152_p3), %vm450_vm0, %v2281_v0  ;;  %2719 = vmatprep.subr.msk.mxu0 (!%p152_p3), %vm450_vm0, %v3122_v1  ;;  %v414_v2 = vld [vmem:[%s3876_s1] sm:$0xf] (!%p152_p3)  ;;  %v2370_v3 = vld [vmem:[%s3876_s1 + $0x14] sm:$0xf] (!%p152_p3)  ;;  %s2461_s28 = sshll.u32 (!%p152_p3), %s3044_s12, 7  ;;  %vm417_vm1 = vcmask (!%p152_p3), 31744  }
   0xb   : > { %2616 = vmatpush3.msk.msra.mxu1 (!%p152_p3), %vm450_vm0, %v2281_v0  ;;  %2720 = vmatpush3.msk.msra.mxu0 (!%p152_p3), %vm450_vm0, %v3122_v1  ;;  %v2388_v10 = vld [vmem:[%s3876_s1 + $0x18] sm:$0xf] (!%p152_p3)  ;;  %v3176_v11 = vld [vmem:[%s3876_s1 + $0x8] sm:$0xf] (!%p152_p3)  ;;  %v3183_v13 = vshrl.u32 (!%p152_p3), %v221_v4, 7  ;;  %vm332_vm2 = vcmask (!%p152_p3), 1046528  }
   0xc   : > { %2641 = vmatprep.subr.msk.mxu1 (!%p152_p3), %vm450_vm0, %v414_v2  ;;  %2745 = vmatprep.subr.msk.mxu0 (!%p152_p3), %vm450_vm0, %v2370_v3  ;;  %v3242_v26 = vld [vmem:[%s3877_s2] ss:$0 sm:$0xff] (!%p152_p3)  ;;  %s3062_s19 = smov (!%p152_p3), 8   ;;  %v3265_v33 = vld [vmem:[%s3876_s1 + $0x1c] sm:$0xf] (!%p152_p3)  ;;  %vm247_vm4 = vcmask (!%p152_p3), 1040384  }
   0xd   : > { %v3207_v16 = vadd.s32 (!%p152_p3), 8, %v3183_v13  ;;  %2077 = vrot.lane.b32.xlu0 (!%p152_p3), %v3242_v26, %s3062_s19  ;;  %vm224_vm5 = vcmp.eq.s32.totalorder (!%p152_p3), %v3183_v13, 0  ;;  %s2275_s26 = sshll.u32 (!%p152_p3), %s3044_s12, 3  ;;  %vm2060_vm6 = vcmask (!%p152_p3), 64512  }
   0xe   : > { %p188_p6 = scmp.lt.s32.totalorder (!%p152_p3), %s2275_s26, 15 }
   0xf   : > { %vm330_vm3 = vcmp.eq.s32.totalorder (!%p152_p3), %v3207_v16, 15 }
  0x10   : > { %s3890_s13 = smov (!%p180_p5, %s3048_s13), 1  ;;  %s3892_s26 = smov (!%p188_p6, %s2275_s26), 15 }
  0x11   : > { %s2979_s27 = smul.u32 320, %s3890_s13 }
  0x13   : > { %s184_s4 = scalar_lea.vmem %s3875_s0, %s2979_s27  ;;  %s2276_s27 = sshll.u32 %s3892_s26, 2 }
  0x14   : > { %s3145_s5 = scalar_lea.vmem %s184_s4, %s2461_s28  ;;  %s2277_s28 = sshll.u32 %s3890_s13, 6 }
  0x15   : > { %v3148_v5 = vld [vmem:[%s3145_s5 + $0x10] sm:$0xff]  ;;  %v3151_v6 = vld [vmem:[%s3145_s5 + $0x20] sm:$0xff]  ;;  %v3154_v7 = vld [vmem:[%s3145_s5 + $0x18] sm:$0xff]  ;;  %s192_s29 = sadd.s32 %s2277_s28, %s2276_s27  ;;  %s3063_s13 = smov 120  }
  0x16   : > { %2617 = vmatprep.mubr.msk.f32.mxu1 %vm417_vm1, %v3148_v5  ;;  %2721 = vmatprep.mubr.msk.f32.mxu0 %vm417_vm1, %v3151_v6  ;;  %v3161_v8 = vld [vmem:[%s3145_s5 + $0x28] sm:$0xff]  ;;  %v3168_v9 = vld [vmem:[%s3145_s5 + $0x30] sm:$0xff]  ;;  %v3181_v12 = vld [vmem:[%s3145_s5 + $0x38] sm:$0xff]  ;;  %v336_v17 = vrot.slane %v3151_v6, 1  ;;  %v249_v42 = vrot.slane %v3148_v5, 7  ;;  %v253_v57 = vrot.slane %v3151_v6, 7 }
  0x17   : > { %2618 = vmatmul.mubr.msk.f32.vlgmr.msra.gmra.mrb[0].mxu1 %vm417_vm1, %v3154_v7  ;;  %2722 = vmatmul.mubr.msk.f32.vlgmr.msra.gmra.mrb[0].mxu0 %vm417_vm1, %v3161_v8  ;;  %v3190_v14 = vld [vmem:[%s3145_s5 + $0x40] sm:$0xff]  ;;  %v3204_v15 = vld [vmem:[%s3145_s5 + $0x48] sm:$0xff]  ;;  %v338_v18 = vrot.slane %v3161_v8, 1  ;;  %v340_v19 = vrot.slane %v3168_v9, 1  ;;  %v3213_v20 = vld [vmem:[%s3145_s5 + $0x50] sm:$0xff]  ;;  %v342_v24 = vrot.slane %v3181_v12, 1 }
  0x18   : > { %2642 = vmatpush3.msk.msra.mxu1 %vm450_vm0, %v414_v2  ;;  %2746 = vmatpush3.msk.msra.mxu0 %vm450_vm0, %v2370_v3  ;;  %v3224_v21 = vld [vmem:[%s3145_s5 + $0x58] sm:$0xff]  ;;  %v344_v25 = vrot.slane %v3190_v14, 1  ;;  %v3253_v28 = vld [vmem:[%s3145_s5 + $0x60] sm:$0xff]  ;;  %v346_v30 = vrot.slane %v3204_v15, 1  ;;  %v348_v31 = vrot.slane %v3213_v20, 1  ;;  %v199_v34 = vld [vmem:[%s3145_s5 + $0x8] sm:$0xff] }
  0x19   : > { %2620 = vmatprep.mubr.msk.f32.mxu1 %vm417_vm1, %v3151_v6  ;;  %2724 = vmatprep.mubr.msk.f32.mxu0 %vm417_vm1, %v3168_v9  ;;  %v3230_v22 = vsel %vm332_vm2, %v336_v17, %v338_v18  ;;  %v341_v23 = vsel %vm332_vm2, %v338_v18, %v340_v19  ;;  %v3260_v32 = vsel %vm332_vm2, %v340_v19, %v342_v24  ;;  %v3276_v35 = vld [vmem:[%s3145_s5 + $0x68] sm:$0xff]  ;;  %v350_v37 = vrot.slane %v3224_v21, 1  ;;  %v3287_v39 = vld [vmem:[%s3145_s5 + $0x70] sm:$0xff]  ;;  %v3297_v44 = vld [vmem:[%s3145_s5 + $0xa0] sm:$0xff]  ;;  %s2278_s30 = sshll.u32 %s192_s29, 3 }
  0x1a   : > { %2771 = vmatprep.subr.msk.mxu0 %vm450_vm0, %v2388_v10  ;;  %2667 = vmatprep.subr.msk.mxu1 %vm450_vm0, %v3176_v11  ;;  %v3250_v27 = vsel %vm330_vm3, 0.0, %v341_v23  ;;  %v345_v29 = vsel %vm332_vm2, %v342_v24, %v344_v25  ;;  %v352_v38 = vrot.slane %v3253_v28, 1  ;;  %v3290_v40 = vsel %vm332_vm2, %v344_v25, %v346_v30  ;;  %v220_v45 = vld [vmem:[%s3145_s5 + $0xb0] sm:$0xff]  ;;  %v3309_v46 = vld [vmem:[%s3145_s5 + $0x78] sm:$0xff]  ;;  %v3321_v51 = vld [vmem:[%s3145_s5 + $0xa8] sm:$0xff] }
  0x1b   : > { %2621 = vmatmul.mubr.msk.f32.gmra.mrb[2].mxu1 %vm417_vm1, %v3161_v8  ;;  %2725 = vmatmul.mubr.msk.f32.gmra.mrb[2].mxu0 %vm417_vm1, %v3181_v12  ;;  %v3280_v36 = vsel %vm330_vm3, 0.0, %v345_v29  ;;  %v349_v41 = vsel %vm332_vm2, %v346_v30, %v348_v31  ;;  %v248_v43 = vrot.slane %v199_v34, 7  ;;  %v3316_v48 = vsel %vm332_vm2, %v348_v31, %v350_v37  ;;  %v3324_v52 = vld [vmem:[%s3145_s5 + $0x80] sm:$0xff]  ;;  %v3348_v62 = vld [vmem:[%s3145_s5 + $0x88] sm:$0xff]  ;;  %v3369_v24 = vld [vmem:[%s3145_s5 + $0x90] sm:$0xff] }
  0x1c   : > { %2623 = vmatprep.mubr.msk.f32.mxu1 %vm417_vm1, %v3168_v9  ;;  %2727 = vmatprep.mubr.msk.f32.mxu0 %vm417_vm1, %v3190_v14  ;;  %v3313_v47 = vsel %vm330_vm3, 0.0, %v349_v41  ;;  %v353_v49 = vsel %vm332_vm2, %v350_v37, %v352_v38  ;;  %v354_v50 = vrot.slane %v3276_v35, 1  ;;  %v356_v53 = vrot.slane %v3287_v39, 1 }
  0x1d   : > { %v368_v54 = vrot.slane %v3297_v44, 1  ;;  %v370_v55 = vrot.slane %v3321_v51, 1  ;;  %v372_v56 = vrot.slane %v220_v45, 1  ;;  %v250_v58 = vsel %vm247_vm4, %v248_v43, %v249_v42  ;;  %v3397_v43 = vld [vmem:[%s3145_s5 + $0x98] sm:$0xff]  ;;  %v3402_v45 = vld [vmem:[%s3876_s1 + $0xc] sm:$0xf]  ;;  %s3746_s5 = scalar_lea.vmem %s3878_s3, %s2278_s30 }
  0x1e   : > { %v251_v61 = vrot.slane %v3154_v7, 7  ;;  %v3352_v63 = vsel %vm330_vm3, 0.0, %v353_v49  ;;  %v358_v0 = vrot.slane %v3309_v46, 1  ;;  %v309_v3 = vsel %vm224_vm5, 0.0, %v250_v58 }
  0x1f   : > { %2624 = vmatmul.mubr.msk.f32.gmra.mrb[4].mxu1 %vm417_vm1, %v3181_v12  ;;  %2728 = vmatmul.mubr.msk.f32.gmra.mrb[4].mxu0 %vm417_vm1, %v3204_v15  ;;  %v3339_v59 = vsel %vm332_vm2, %v368_v54, %v370_v55  ;;  %v373_v60 = vsel %vm332_vm2, %v370_v55, %v372_v56  ;;  %v3362_v4 = vsel %vm332_vm2, %v352_v38, %v354_v50  ;;  %v360_v18 = vrot.slane %v3324_v52, 1 }
  0x20   : > { %2626 = vmatprep.mubr.msk.f32.mxu1 %vm417_vm1, %v3190_v14  ;;  %2730 = vmatprep.mubr.msk.f32.mxu0 %vm417_vm1, %v3213_v20  ;;  %v3357_v2 = vsel %vm330_vm3, 0.0, %v373_v60  ;;  %v254_v19 = vsel %vm247_vm4, %v251_v61, %v253_v57  ;;  %v257_v23 = vrot.slane %v3168_v9, 7  ;;  %v255_v25 = vrot.slane %v3161_v8, 7 }
  0x21   : > { %v252_v29 = vsel %vm247_vm4, %v249_v42, %v251_v61  ;;  %v3386_v31 = vsel %vm224_vm5, 0.0, %v254_v19  ;;  %v361_v34 = vsel %vm332_vm2, %v358_v0, %v360_v18  ;;  %v362_v37 = vrot.slane %v3348_v62, 1 }
  0x22   : > { %v364_v8 = vrot.slane %v3369_v24, 1  ;;  %v3392_v38 = vsel %vm332_vm2, %v356_v53, %v358_v0  ;;  %v258_v41 = vsel %vm247_vm4, %v255_v25, %v257_v23  ;;  %v261_v42 = vrot.slane %v3190_v14, 7 }
  0x23   : > { %2627 = vmatmul.mubr.msk.f32.gmra.mrb[6].mxu1 %vm417_vm1, %v3204_v15  ;;  %2731 = vmatmul.mubr.msk.f32.gmra.mrb[6].mxu0 %vm417_vm1, %v3224_v21  ;;  %v3412_v49 = vsel %vm247_vm4, %v253_v57, %v255_v25  ;;  %v3423_v55 = vsel %vm224_vm5, 0.0, %v258_v41  ;;  %v366_v57 = vrot.slane %v3397_v43, 1  ;;  %v265_v60 = vrot.slane %v3213_v20, 7 }
  0x24   : > { %2629 = vmatprep.mubr.msk.f32.mxu1 %vm417_vm1, %v3213_v20  ;;  %2747 = vmatprep.mubr.msk.f32.mxu0 %vm417_vm1, %v3230_v22  ;;  %v365_v56 = vsel %vm332_vm2, %v362_v37, %v364_v8  ;;  %v269_v25 = vrot.slane %v3253_v28, 7  ;;  %v273_v41 = vrot.slane %v3287_v39, 7 }
  0x25   : > { %v3447_v0 = vsel %vm330_vm3, 0.0, %v365_v56  ;;  %v369_v19 = vsel %vm332_vm2, %v366_v57, %v368_v54 }
  0x26   : > { %v3475_v54 = vsel %vm330_vm3, 0.0, %v369_v19  ;;  %v275_v19 = vrot.slane %v3309_v46, 7 }
  0x27   : > { %2630 = vmatmul.mubr.msk.f32.gmra.mrb[8].mxu1 %vm417_vm1, %v3224_v21  ;;  %2748 = vmatmul.mubr.msk.f32.vlgmr.msra.gmra.mrb[0].mxu0 %vm417_vm1, %v3250_v27 }
  0x28   : > { %2772 = vmatpush3.msk.msra.mxu0 %vm450_vm0, %v2388_v10  ;;  %2632 = vmatprep.mubr.msk.f32.mxu1 %vm417_vm1, %v3253_v28  ;;  %v357_v10 = vsel %vm332_vm2, %v354_v50, %v356_v53  ;;  %v3416_v50 = vsel %vm330_vm3, 0.0, %v361_v34  ;;  %v259_v53 = vrot.slane %v3181_v12, 7  ;;  %v267_v34 = vrot.slane %v3224_v21, 7 }
  0x29   : > { %2750 = vmatprep.mubr.msk.f32.mxu0 %vm417_vm1, %v3260_v32  ;;  %2797 = vmatprep.subr.msk.mxu0 %vm450_vm0, %v3265_v33  ;;  %v3382_v30 = vsel %vm330_vm3, 0.0, %v357_v10 }
  0x2a   : > { %v262_v58 = vsel %vm247_vm4, %v259_v53, %v261_v42  ;;  %v3443_v61 = vsel %vm247_vm4, %v257_v23, %v259_v53  ;;  %v271_v53 = vrot.slane %v3276_v35, 7 }
  0x2b   : > { %2633 = vmatmul.mubr.msk.f32.gmra.mrb[10].mxu1 %vm417_vm1, %v3276_v35  ;;  %2751 = vmatmul.mubr.msk.f32.gmra.mrb[2].mxu0 %vm417_vm1, %v3280_v36  ;;  %v3452_v10 = vsel %vm224_vm5, 0.0, %v262_v58  ;;  %v277_v58 = vrot.slane %v3324_v52, 7 }
  0x2c   : > { %2635 = vmatprep.mubr.msk.f32.mxu1 %vm417_vm1, %v3287_v39  ;;  %2753 = vmatprep.mubr.msk.f32.mxu0 %vm417_vm1, %v3290_v40 }
  0x2f   : > { %2636 = vmatmul.mubr.msk.f32.gmra.mrb[12].mxu1 %vm417_vm1, %v3309_v46  ;;  %2754 = vmatmul.mubr.msk.f32.gmra.mrb[4].mxu0 %vm417_vm1, %v3313_v47 }
  0x30   : > { %2638 = vmatprep.mubr.msk.f32.mxu1 %vm417_vm1, %v3324_v52  ;;  %2756 = vmatprep.mubr.msk.f32.mxu0 %vm417_vm1, %v3316_v48 }
  0x33   : > { %2639 = vmatmul.mubr.msk.f32.gmra.mrb[14].mxu1 %vm417_vm1, %v3348_v62  ;;  %2757 = vmatmul.mubr.msk.f32.gmra.mrb[6].mxu0 %vm417_vm1, %v3352_v63 }
  0x34   : > { %2643 = vmatprep.mubr.msk.f32.mxu1 %vm417_vm1, %v309_v3  ;;  %2759 = vmatprep.mubr.msk.f32.mxu0 %vm417_vm1, %v3362_v4  ;;  %v263_v3 = vrot.slane %v3204_v15, 7 }
  0x36   : > { %v266_v23 = vsel %vm247_vm4, %v263_v3, %v265_v60 }
  0x37   : > { %2644 = vmatmul.mubr.msk.f32.vlgmr.msra.gmra.mrb[0].mxu1 %vm417_vm1, %v252_v29  ;;  %2760 = vmatmul.mubr.msk.f32.gmra.mrb[8].mxu0 %vm417_vm1, %v3382_v30  ;;  %v3471_v29 = vsel %vm247_vm4, %v261_v42, %v263_v3  ;;  %v3493_v42 = vsel %vm247_vm4, %v265_v60, %v267_v34  ;;  %v2424_v3 = vld [vmem:[%s3876_s1 + $0x20] sm:$0xf]  ;;  %v3514_v60 = vsel %vm247_vm4, %v269_v25, %v271_v53 }
  0x38   : > { %2668 = vmatpush3.msk.msra.mxu1 %vm450_vm0, %v3176_v11  ;;  %2646 = vmatprep.mubr.msk.f32.mxu1 %vm417_vm1, %v3386_v31  ;;  %v3426_v11 = vsel %vm332_vm2, %v360_v18, %v362_v37  ;;  %v3455_v18 = vsel %vm332_vm2, %v364_v8, %v366_v57  ;;  %v3480_v37 = vsel %vm224_vm5, 0.0, %v266_v23  ;;  %v270_v8 = vsel %vm247_vm4, %v267_v34, %v269_v25 }
  0x39   : > { %2762 = vmatprep.mubr.msk.f32.mxu0 %vm417_vm1, %v3392_v38  ;;  %2693 = vmatprep.subr.msk.mxu1 %vm450_vm0, %v3402_v45  ;;  %v3498_v56 = vsel %vm224_vm5, 0.0, %v270_v8  ;;  %v274_v57 = vsel %vm247_vm4, %v271_v53, %v273_v41  ;;  %v278_v34 = vsel %vm247_vm4, %v275_v19, %v277_v58  ;;  %v279_v25 = vrot.slane %v3348_v62, 7 }
  0x3a   : > { %v3521_v23 = vsel %vm224_vm5, 0.0, %v274_v57  ;;  %v333_v8 = vrot.slane %v3148_v5, 1  ;;  %v334_v53 = vrot.slane %v3154_v7, 1  ;;  %v3541_v57 = vsel %vm224_vm5, 0.0, %v278_v34 }
  0x3b   : > { %2647 = vmatmul.mubr.msk.f32.gmra.mrb[2].mxu1 %vm417_vm1, %v3412_v49  ;;  %2763 = vmatmul.mubr.msk.f32.gmra.mrb[10].mxu0 %vm417_vm1, %v3416_v50  ;;  %v3552_v5 = vsel %vm247_vm4, %v277_v58, %v279_v25  ;;  %v283_v34 = vrot.slane %v3397_v43, 7 }
  0x3c   : > { %2649 = vmatprep.mubr.msk.f32.mxu1 %vm417_vm1, %v3423_v55  ;;  %2765 = vmatprep.mubr.msk.f32.mxu0 %vm417_vm1, %v3426_v11  ;;  %v335_v7 = vsel %vm332_vm2, %v333_v8, %v334_v53 }
  0x3f   : > { %2650 = vmatmul.mubr.msk.f32.gmra.mrb[4].mxu1 %vm417_vm1, %v3443_v61  ;;  %2766 = vmatmul.mubr.msk.f32.gmra.mrb[12].mxu0 %vm417_vm1, %v3447_v0 }
  0x40   : > { %2652 = vmatprep.mubr.msk.f32.mxu1 %vm417_vm1, %v3452_v10  ;;  %2768 = vmatprep.mubr.msk.f32.mxu0 %vm417_vm1, %v3455_v18 }
  0x43   : > { %2653 = vmatmul.mubr.msk.f32.gmra.mrb[6].mxu1 %vm417_vm1, %v3471_v29  ;;  %2769 = vmatmul.mubr.msk.f32.gmra.mrb[14].mxu0 %vm417_vm1, %v3475_v54 }
  0x44   : > { %2655 = vmatprep.mubr.msk.f32.mxu1 %vm417_vm1, %v3480_v37  ;;  %2773 = vmatprep.mubr.msk.f32.mxu0 %vm417_vm1, %v3423_v55 }
  0x47   : > { %2656 = vmatmul.mubr.msk.f32.gmra.mrb[8].mxu1 %vm417_vm1, %v3493_v42  ;;  %2774 = vmatmul.mubr.msk.f32.vlgmr.msra.gmra.mrb[0].mxu0 %vm417_vm1, %v3443_v61 }
  0x48   : > { %2798 = vmatpush3.msk.msra.mxu0 %vm450_vm0, %v3265_v33  ;;  %2658 = vmatprep.mubr.msk.f32.mxu1 %vm417_vm1, %v3498_v56  ;;  %v3534_v33 = vsel %vm247_vm4, %v273_v41, %v275_v19  ;;  %v337_v41 = vsel %vm332_vm2, %v334_v53, %v336_v17  ;;  %v281_v19 = vrot.slane %v3369_v24, 7  ;;  %v285_v17 = vrot.slane %v3297_v44, 7 }
  0x49   : > { %2776 = vmatprep.mubr.msk.f32.mxu0 %vm417_vm1, %v3452_v10  ;;  %2823 = vmatprep.subr.msk.mxu0 %vm450_vm0, %v2424_v3  ;;  %v395_v58 = vsel %vm330_vm3, 0.0, %v337_v41 }
  0x4a   : > { %v282_v6 = vsel %vm247_vm4, %v279_v25, %v281_v19  ;;  %v286_v25 = vsel %vm247_vm4, %v283_v34, %v285_v17 }
  0x4b   : > { %2659 = vmatmul.mubr.msk.f32.gmra.mrb[10].mxu1 %vm417_vm1, %v3514_v60  ;;  %2777 = vmatmul.mubr.msk.f32.gmra.mrb[2].mxu0 %vm417_vm1, %v3471_v29  ;;  %v3582_v16 = vsel %vm224_vm5, 0.0, %v282_v6  ;;  %v327_v8 = vsel %vm224_vm5, 0.0, %v286_v25 }
  0x4c   : > { %2661 = vmatprep.mubr.msk.f32.mxu1 %vm417_vm1, %v3521_v23  ;;  %2779 = vmatprep.mubr.msk.f32.mxu0 %vm417_vm1, %v3480_v37 }
  0x4f   : > { %2662 = vmatmul.mubr.msk.f32.gmra.mrb[12].mxu1 %vm417_vm1, %v3534_v33  ;;  %2780 = vmatmul.mubr.msk.f32.gmra.mrb[4].mxu0 %vm417_vm1, %v3493_v42 }
  0x50   : > { %2664 = vmatprep.mubr.msk.f32.mxu1 %vm417_vm1, %v3541_v57  ;;  %2782 = vmatprep.mubr.msk.f32.mxu0 %vm417_vm1, %v3498_v56 }
  0x53   : > { %2665 = vmatmul.mubr.msk.f32.gmra.mrb[14].mxu1 %vm417_vm1, %v3552_v5  ;;  %2783 = vmatmul.mubr.msk.f32.gmra.mrb[6].mxu0 %vm417_vm1, %v3514_v60 }
  0x54   : > { %2669 = vmatprep.mubr.msk.f32.mxu1 %vm417_vm1, %v335_v7  ;;  %2785 = vmatprep.mubr.msk.f32.mxu0 %vm417_vm1, %v3521_v23 }
  0x57   : > { %2670 = vmatmul.mubr.msk.f32.vlgmr.msra.gmra.mrb[0].mxu1 %vm417_vm1, %v395_v58  ;;  %2786 = vmatmul.mubr.msk.f32.gmra.mrb[8].mxu0 %vm417_vm1, %v3534_v33 }
  0x58   : > { %2694 = vmatpush3.msk.msra.mxu1 %vm450_vm0, %v3402_v45  ;;  %2672 = vmatprep.mubr.msk.f32.mxu1 %vm417_vm1, %v3230_v22  ;;  %v284_v22 = vsel %vm247_vm4, %v281_v19, %v283_v34  ;;  %v287_v45 = vrot.slane %v3321_v51, 7 }
  0x59   : > { %2788 = vmatprep.mubr.msk.f32.mxu0 %vm417_vm1, %v3541_v57  ;;  %2849 = vmatprep.subr.msk.mxu1 %vm450_vm0, %v3122_v1 }
  0x5b   : > { %2673 = vmatmul.mubr.msk.f32.gmra.mrb[2].mxu1 %vm417_vm1, %v3250_v27  ;;  %2789 = vmatmul.mubr.msk.f32.gmra.mrb[10].mxu0 %vm417_vm1, %v3552_v5  ;;  %v288_v27 = vsel %vm247_vm4, %v285_v17, %v287_v45 }
  0x5c   : > { %2675 = vmatprep.mubr.msk.f32.mxu1 %vm417_vm1, %v3260_v32  ;;  %2791 = vmatprep.mubr.msk.f32.mxu0 %vm417_vm1, %v3582_v16 }
  0x5f   : > { %2676 = vmatmul.mubr.msk.f32.gmra.mrb[4].mxu1 %vm417_vm1, %v3280_v36  ;;  %2792 = vmatmul.mubr.msk.f32.gmra.mrb[12].mxu0 %vm417_vm1, %v284_v22 }
  0x60   : > { %2678 = vmatprep.mubr.msk.f32.mxu1 %vm417_vm1, %v3290_v40  ;;  %2794 = vmatprep.mubr.msk.f32.mxu0 %vm417_vm1, %v327_v8 }
  0x63   : > { %2679 = vmatmul.mubr.msk.f32.gmra.mrb[6].mxu1 %vm417_vm1, %v3313_v47  ;;  %2795 = vmatmul.mubr.msk.f32.gmra.mrb[14].mxu0 %vm417_vm1, %v288_v27 }
  0x64   : > { %2681 = vmatprep.mubr.msk.f32.mxu1 %vm417_vm1, %v3316_v48  ;;  %2799 = vmatprep.mubr.msk.f32.mxu0 %vm417_vm1, %v3168_v9 }
  0x67   : > { %2682 = vmatmul.mubr.msk.f32.gmra.mrb[8].mxu1 %vm417_vm1, %v3352_v63  ;;  %2800 = vmatmul.mubr.msk.f32.vlgmr.msra.gmra.mrb[0].mxu0 %vm417_vm1, %v3181_v12 }
  0x68   : > { %2824 = vmatpush3.msk.msra.mxu0 %vm450_vm0, %v2424_v3  ;;  %2684 = vmatprep.mubr.msk.f32.mxu1 %vm417_vm1, %v3362_v4 }
  0x69   : > { %2802 = vmatprep.mubr.msk.f32.mxu0 %vm417_vm1, %v3190_v14 }
  0x6b   : > { %2685 = vmatmul.mubr.msk.f32.gmra.mrb[10].mxu1 %vm417_vm1, %v3382_v30  ;;  %2803 = vmatmul.mubr.msk.f32.gmra.mrb[2].mxu0 %vm417_vm1, %v3204_v15 }
  0x6c   : > { %2687 = vmatprep.mubr.msk.f32.mxu1 %vm417_vm1, %v3392_v38  ;;  %2805 = vmatprep.mubr.msk.f32.mxu0 %vm417_vm1, %v3213_v20 }
  0x6f   : > { %2688 = vmatmul.mubr.msk.f32.gmra.mrb[12].mxu1 %vm417_vm1, %v3416_v50  ;;  %2806 = vmatmul.mubr.msk.f32.gmra.mrb[4].mxu0 %vm417_vm1, %v3224_v21 }
  0x70   : > { %2690 = vmatprep.mubr.msk.f32.mxu1 %vm417_vm1, %v3426_v11  ;;  %2808 = vmatprep.mubr.msk.f32.mxu0 %vm417_vm1, %v3253_v28 }
  0x73   : > { %2691 = vmatmul.mubr.msk.f32.gmra.mrb[14].mxu1 %vm417_vm1, %v3447_v0  ;;  %2809 = vmatmul.mubr.msk.f32.gmra.mrb[6].mxu0 %vm417_vm1, %v3276_v35 }
  0x74   : > { %2695 = vmatprep.mubr.msk.f32.mxu1 %vm417_vm1, %v3386_v31  ;;  %2811 = vmatprep.mubr.msk.f32.mxu0 %vm417_vm1, %v3287_v39 }
  0x77   : > { %2696 = vmatmul.mubr.msk.f32.vlgmr.msra.gmra.mrb[0].mxu1 %vm417_vm1, %v3412_v49  ;;  %2812 = vmatmul.mubr.msk.f32.gmra.mrb[8].mxu0 %vm417_vm1, %v3309_v46 }
  0x78   : > { %2850 = vmatpush3.msk.msra.mxu1 %vm450_vm0, %v3122_v1  ;;  %2698 = vmatprep.mubr.msk.f32.mxu1 %vm417_vm1, %v3423_v55 }
  0x79   : > { %2814 = vmatprep.mubr.msk.f32.mxu0 %vm417_vm1, %v3324_v52 }
  0x7b   : > { %2699 = vmatmul.mubr.msk.f32.gmra.mrb[2].mxu1 %vm417_vm1, %v3443_v61  ;;  %2815 = vmatmul.mubr.msk.f32.gmra.mrb[10].mxu0 %vm417_vm1, %v3348_v62 }
  0x7c   : > { %2701 = vmatprep.mubr.msk.f32.mxu1 %vm417_vm1, %v3452_v10  ;;  %2817 = vmatprep.mubr.msk.f32.mxu0 %vm417_vm1, %v3369_v24 }
  0x7f   : > { %2702 = vmatmul.mubr.msk.f32.gmra.mrb[4].mxu1 %vm417_vm1, %v3471_v29  ;;  %2818 = vmatmul.mubr.msk.f32.gmra.mrb[12].mxu0 %vm417_vm1, %v3397_v43 }
  0x80   : > { %2704 = vmatprep.mubr.msk.f32.mxu1 %vm417_vm1, %v3480_v37  ;;  %2820 = vmatprep.mubr.msk.f32.mxu0 %vm417_vm1, %v3297_v44 }
  0x83   : > { %2705 = vmatmul.mubr.msk.f32.gmra.mrb[6].mxu1 %vm417_vm1, %v3493_v42  ;;  %2821 = vmatmul.mubr.msk.f32.gmra.mrb[14].mxu0 %vm417_vm1, %v3321_v51 }
  0x84   : > { %2707 = vmatprep.mubr.msk.f32.mxu1 %vm417_vm1, %v3498_v56  ;;  %2825 = vmatprep.mubr.msk.f32.mxu0 %vm417_vm1, %v3260_v32  ;;  %v3741_v32 = vpop.permute.xlu0 %2077 }
  0x87   : > { %2708 = vmatmul.mubr.msk.f32.gmra.mrb[8].mxu1 %vm417_vm1, %v3514_v60  ;;  %2826 = vmatmul.mubr.msk.f32.vlgmr.msra.gmra.mrb[0].mxu0 %vm417_vm1, %v3280_v36 }
  0x88   : > { %2710 = vmatprep.mubr.msk.f32.mxu1 %vm417_vm1, %v3521_v23  ;;  %2828 = vmatprep.mubr.msk.f32.mxu0 %vm417_vm1, %v3290_v40 }
  0x8b   : > { %2711 = vmatmul.mubr.msk.f32.gmra.mrb[10].mxu1 %vm417_vm1, %v3534_v33  ;;  %2829 = vmatmul.mubr.msk.f32.gmra.mrb[2].mxu0 %vm417_vm1, %v3313_v47 }
  0x8c   : > { %2713 = vmatprep.mubr.msk.f32.mxu1 %vm417_vm1, %v3541_v57  ;;  %2831 = vmatprep.mubr.msk.f32.mxu0 %vm417_vm1, %v3316_v48 }
  0x8f   : > { %2714 = vmatmul.mubr.msk.f32.gmra.mrb[12].mxu1 %vm417_vm1, %v3552_v5  ;;  %2832 = vmatmul.mubr.msk.f32.gmra.mrb[4].mxu0 %vm417_vm1, %v3352_v63 }
  0x90   : > { %2716 = vmatprep.mubr.msk.f32.mxu1 %vm417_vm1, %v3582_v16  ;;  %2834 = vmatprep.mubr.msk.f32.mxu0 %vm417_vm1, %v3362_v4 }
  0x93   : > { %2717 = vmatmul.mubr.msk.f32.gmra.mrb[14].mxu1 %vm417_vm1, %v284_v22  ;;  %2835 = vmatmul.mubr.msk.f32.gmra.mrb[6].mxu0 %vm417_vm1, %v3382_v30 }
  0x94   : > { %2733 = vmatprep.mubr.msk.f32.mxu1 %vm417_vm1, %v3253_v28  ;;  %2837 = vmatprep.mubr.msk.f32.mxu0 %vm417_vm1, %v3392_v38 }
  0x97   : > { %2734 = vmatmul.mubr.msk.f32.vlgmr.msra.gmra.mrb[8].mxu1 %vm417_vm1, %v3276_v35  ;;  %2838 = vmatmul.mubr.msk.f32.gmra.mrb[8].mxu0 %vm417_vm1, %v3416_v50 }
  0x98   : > { %2736 = vmatprep.mubr.msk.f32.mxu1 %vm417_vm1, %v3287_v39  ;;  %2840 = vmatprep.mubr.msk.f32.mxu0 %vm417_vm1, %v3426_v11 }
  0x9b   : > { %2737 = vmatmul.mubr.msk.f32.gmra.mrb[10].mxu1 %vm417_vm1, %v3309_v46  ;;  %2841 = vmatmul.mubr.msk.f32.gmra.mrb[10].mxu0 %vm417_vm1, %v3447_v0 }
  0x9c   : > { %2739 = vmatprep.mubr.msk.f32.mxu1 %vm417_vm1, %v3324_v52  ;;  %2843 = vmatprep.mubr.msk.f32.mxu0 %vm417_vm1, %v3455_v18 }
  0x9f   : > { %2740 = vmatmul.mubr.msk.f32.gmra.mrb[12].mxu1 %vm417_vm1, %v3348_v62  ;;  %2844 = vmatmul.mubr.msk.f32.gmra.mrb[12].mxu0 %vm417_vm1, %v3475_v54 }
  0xa0   : > { %2742 = vmatprep.mubr.msk.f32.mxu1 %vm417_vm1, %v3369_v24  ;;  %2846 = vmatprep.mubr.msk.f32.mxu0 %vm417_vm1, %v3339_v59 }
  0xa3   : > { %2743 = vmatmul.mubr.msk.f32.gmra.mrb[14].mxu1 %vm417_vm1, %v3397_v43  ;;  %2847 = vmatmul.mubr.msk.f32.gmra.mrb[14].mxu0 %vm417_vm1, %v3357_v2 }
 0x14a   : > { %v2697_v1 = vpop.f32.mrb[0].mxu1 }
 0x14b   : > { %v1086_v9 = vpop.f32.mrb[1].mxu1 }
 0x14e   : > { %v2700_v12 = vpop.f32.mrb[2].mxu1 }
 0x14f   : > { %v1096_v13 = vpop.f32.mrb[3].mxu1 }
 0x152   : > { %v2703_v14 = vpop.f32.mrb[4].mxu1 }
 0x153   : > { %v1106_v15 = vpop.f32.mrb[5].mxu1 }
 0x156   : > { %v2706_v20 = vpop.f32.mrb[6].mxu1 }
 0x157   : > { %v1116_v21 = vpop.f32.mrb[7].mxu1 }
 0x15a   : > { %v2827_v28 = vpop.f32.mrb[0].mxu0 }
 0x15b   : > { %v2851_v35 = vadd.f32 %v2827_v28, %v2697_v1  ;;  %v1942_v36 = vpop.f32.mrb[1].mxu0 }
 0x15c   : > { %v2852_v39 = vadd.f32 %v1942_v36, %v1086_v9 }
 0x15d   : > { %v2045_v40 = vadd.f32 %v2851_v35, %v3242_v26  ;;  %v2081_v44 = vadd.f32 %v2851_v35, %v3741_v32 }
 0x15e   : > { %v2044_v46 = vadd.f32 %v2852_v39, %v3242_v26  ;;  %v2830_v47 = vpop.f32.mrb[2].mxu0  ;;  %v2080_v48 = vadd.f32 %v2852_v39, %v3741_v32 }
 0x15f   : > { %2062 = vst.msk [vmem:[%s3746_s5 + $0x8] sm:$0xff] %vm2060_vm6, %v2045_v40  ;;  %v2853_v51 = vadd.f32 %v2830_v47, %v2700_v12  ;;  %v1952_v52 = vpop.f32.mrb[3].mxu0  ;;  %2114 = vrot.lane.b32.xlu1 %v2081_v44, %s3063_s13 }
 0x160   : > { %2061 = vst.msk [vmem:[%s3746_s5] sm:$0xff] %vm2060_vm6, %v2044_v46  ;;  %v2854_v59 = vadd.f32 %v1952_v52, %v1096_v13  ;;  %2112 = vrot.lane.b32.xlu0 %v2080_v48, %s3063_s13 }
 0x161   : > { %v2047_v62 = vadd.f32 %v2853_v51, %v3242_v26  ;;  %v2083_v63 = vadd.f32 %v2853_v51, %v3741_v32 }
 0x162   : > { %v2046_v2 = vadd.f32 %v2854_v59, %v3242_v26  ;;  %v2082_v4 = vadd.f32 %v2854_v59, %v3741_v32  ;;  %v2833_v24 = vpop.f32.mrb[4].mxu0 }
 0x163   : > { %2064 = vst.msk [vmem:[%s3746_s5 + $0x28] sm:$0xff] %vm2060_vm6, %v2047_v62  ;;  %v2855_v30 = vadd.f32 %v2833_v24, %v2703_v14  ;;  %v1962_v31 = vpop.f32.mrb[5].mxu0 }
 0x164   : > { %2063 = vst.msk [vmem:[%s3746_s5 + $0x20] sm:$0xff] %vm2060_vm6, %v2046_v2  ;;  %v2856_v38 = vadd.f32 %v1962_v31, %v1106_v15  ;;  %2118 = vrot.lane.b32.xlu0 %v2083_v63, %s3063_s13  ;;  %2116 = vrot.lane.b32.xlu1 %v2082_v4, %s3063_s13 }
 0x165   : > { %v2049_v43 = vadd.f32 %v2855_v30, %v3242_v26  ;;  %v2085_v49 = vadd.f32 %v2855_v30, %v3741_v32 }
 0x166   : > { %v2048_v50 = vadd.f32 %v2856_v38, %v3242_v26  ;;  %v2084_v55 = vadd.f32 %v2856_v38, %v3741_v32  ;;  %v2836_v11 = vpop.f32.mrb[6].mxu0 }
 0x167   : > { %2066 = vst.msk [vmem:[%s3746_s5 + $0x48] sm:$0xff] %vm2060_vm6, %v2049_v43  ;;  %v2857_v61 = vadd.f32 %v2836_v11, %v2706_v20  ;;  %v1972_v0 = vpop.f32.mrb[7].mxu0 }
 0x168   : > { %2065 = vst.msk [vmem:[%s3746_s5 + $0x40] sm:$0xff] %vm2060_vm6, %v2048_v50  ;;  %v2858_v10 = vadd.f32 %v1972_v0, %v1116_v21  ;;  %2122 = vrot.lane.b32.xlu0 %v2085_v49, %s3063_s13  ;;  %2120 = vrot.lane.b32.xlu1 %v2084_v55, %s3063_s13 }
 0x169   : > { %v2051_v18 = vadd.f32 %v2857_v61, %v3242_v26  ;;  %v2087_v29 = vadd.f32 %v2857_v61, %v3741_v32 }
 0x16a   : > { %v2050_v54 = vadd.f32 %v2858_v10, %v3242_v26  ;;  %v2086_v37 = vadd.f32 %v2858_v10, %v3741_v32  ;;  %v2735_v42 = vpop.f32.mrb[8].mxu1  ;;  %v2839_v56 = vpop.f32.mrb[8].mxu0 }
 0x16b   : > { %2068 = vst.msk [vmem:[%s3746_s5 + $0x68] sm:$0xff] %vm2060_vm6, %v2051_v18  ;;  %v2859_v3 = vadd.f32 %v2839_v56, %v2735_v42  ;;  %v1296_v60 = vpop.f32.mrb[9].mxu1  ;;  %v1982_v23 = vpop.f32.mrb[9].mxu0 }
 0x16c   : > { %2067 = vst.msk [vmem:[%s3746_s5 + $0x60] sm:$0xff] %vm2060_vm6, %v2050_v54  ;;  %v2860_v33 = vadd.f32 %v1982_v23, %v1296_v60  ;;  %2126 = vrot.lane.b32.xlu0 %v2087_v29, %s3063_s13  ;;  %2124 = vrot.lane.b32.xlu1 %v2086_v37, %s3063_s13 }
 0x16d   : > { %v2053_v53 = vadd.f32 %v2859_v3, %v3242_v26  ;;  %v2089_v57 = vadd.f32 %v2859_v3, %v3741_v32 }
 0x16e   : > { %v2052_v5 = vadd.f32 %v2860_v33, %v3242_v26  ;;  %v2088_v7 = vadd.f32 %v2860_v33, %v3741_v32  ;;  %v2738_v41 = vpop.f32.mrb[10].mxu1  ;;  %v2842_v19 = vpop.f32.mrb[10].mxu0 }
 0x16f   : > { %2070 = vst.msk [vmem:[%s3746_s5 + $0x88] sm:$0xff] %vm2060_vm6, %v2053_v53  ;;  %v2861_v58 = vadd.f32 %v2842_v19, %v2738_v41  ;;  %v1306_v6 = vpop.f32.mrb[11].mxu1  ;;  %v1992_v17 = vpop.f32.mrb[11].mxu0 }
 0x170   : > { %2069 = vst.msk [vmem:[%s3746_s5 + $0x80] sm:$0xff] %vm2060_vm6, %v2052_v5  ;;  %v2862_v34 = vadd.f32 %v1992_v17, %v1306_v6  ;;  %2130 = vrot.lane.b32.xlu0 %v2089_v57, %s3063_s13  ;;  %2128 = vrot.lane.b32.xlu1 %v2088_v7, %s3063_s13 }
 0x171   : > { %v2055_v16 = vadd.f32 %v2861_v58, %v3242_v26  ;;  %v2091_v25 = vadd.f32 %v2861_v58, %v3741_v32 }
 0x172   : > { %v2054_v22 = vadd.f32 %v2862_v34, %v3242_v26  ;;  %v2090_v45 = vadd.f32 %v2862_v34, %v3741_v32  ;;  %v2741_v8 = vpop.f32.mrb[12].mxu1  ;;  %v2845_v27 = vpop.f32.mrb[12].mxu0 }
 0x173   : > { %2072 = vst.msk [vmem:[%s3746_s5 + $0xa8] sm:$0xff] %vm2060_vm6, %v2055_v16  ;;  %v2863_v1 = vadd.f32 %v2845_v27, %v2741_v8  ;;  %v1316_v9 = vpop.f32.mrb[13].mxu1  ;;  %v2002_v12 = vpop.f32.mrb[13].mxu0 }
 0x174   : > { %2071 = vst.msk [vmem:[%s3746_s5 + $0xa0] sm:$0xff] %vm2060_vm6, %v2054_v22  ;;  %v2864_v13 = vadd.f32 %v2002_v12, %v1316_v9  ;;  %2134 = vrot.lane.b32.xlu0 %v2091_v25, %s3063_s13  ;;  %2132 = vrot.lane.b32.xlu1 %v2090_v45, %s3063_s13 }
 0x175   : > { %v2057_v14 = vadd.f32 %v2863_v1, %v3242_v26  ;;  %v2093_v15 = vadd.f32 %v2863_v1, %v3741_v32 }
 0x176   : > { %v2056_v20 = vadd.f32 %v2864_v13, %v3242_v26  ;;  %v2092_v21 = vadd.f32 %v2864_v13, %v3741_v32  ;;  %v2744_v28 = vpop.f32.mrb[14].mxu1  ;;  %v2848_v35 = vpop.f32.mrb[14].mxu0 }
 0x177   : > { %2074 = vst.msk [vmem:[%s3746_s5 + $0xc8] sm:$0xff] %vm2060_vm6, %v2057_v14  ;;  %v2865_v36 = vadd.f32 %v2848_v35, %v2744_v28  ;;  %v1326_v39 = vpop.f32.mrb[15].mxu1  ;;  %v2012_v40 = vpop.f32.mrb[15].mxu0 }
 0x178   : > { %2073 = vst.msk [vmem:[%s3746_s5 + $0xc0] sm:$0xff] %vm2060_vm6, %v2056_v20  ;;  %v2866_v44 = vadd.f32 %v2012_v40, %v1326_v39  ;;  %2138 = vrot.lane.b32.xlu0 %v2093_v15, %s3063_s13  ;;  %2136 = vrot.lane.b32.xlu1 %v2092_v21, %s3063_s13 }
 0x179   : > { %v2059_v46 = vadd.f32 %v2865_v36, %v3242_v26  ;;  %v2095_v47 = vadd.f32 %v2865_v36, %v3741_v32 }
 0x17a   : > { %v2058_v48 = vadd.f32 %v2866_v44, %v3242_v26  ;;  %v2094_v51 = vadd.f32 %v2866_v44, %v3741_v32 }
 0x17b   : > { %2076 = vst.msk [vmem:[%s3746_s5 + $0xe8] sm:$0xff] %vm2060_vm6, %v2059_v46 }
 0x17c   : > { %2075 = vst.msk [vmem:[%s3746_s5 + $0xe0] sm:$0xff] %vm2060_vm6, %v2058_v48  ;;  %2142 = vrot.lane.b32.xlu0 %v2095_v47, %s3063_s13  ;;  %2140 = vrot.lane.b32.xlu1 %v2094_v51, %s3063_s13 }
 0x1d1   : > { %v2115_v52 = vpop.permute.xlu1 %2114 }
 0x1d2   : > { %2444 = vst.msk [vmem:[%s3746_s5 + $0x18] sm:$0xff] %vm2060_vm6, %v2115_v52  ;;  %v2113_v59 = vpop.permute.xlu0 %2112 }
 0x1d3   : > { %2443 = vst.msk [vmem:[%s3746_s5 + $0x10] sm:$0xff] %vm2060_vm6, %v2113_v59 }
 0x1d6   : > { %v2119_v26 = vpop.permute.xlu0 %2118  ;;  %v2117_v32 = vpop.permute.xlu1 %2116 }
 0x1d7   : > { %2446 = vst.msk [vmem:[%s3746_s5 + $0x38] sm:$0xff] %vm2060_vm6, %v2119_v26  ;;  %2445 = vst.msk [vmem:[%s3746_s5 + $0x30] sm:$0xff] %vm2060_vm6, %v2117_v32 }
 0x1da   : > { %v2123_v62 = vpop.permute.xlu0 %2122  ;;  %v2121_v63 = vpop.permute.xlu1 %2120 }
 0x1db   : > { %2448 = vst.msk [vmem:[%s3746_s5 + $0x58] sm:$0xff] %vm2060_vm6, %v2123_v62  ;;  %2447 = vst.msk [vmem:[%s3746_s5 + $0x50] sm:$0xff] %vm2060_vm6, %v2121_v63 }
 0x1de   : > { %v2127_v2 = vpop.permute.xlu0 %2126  ;;  %v2125_v4 = vpop.permute.xlu1 %2124 }
 0x1df   : > { %2450 = vst.msk [vmem:[%s3746_s5 + $0x78] sm:$0xff] %vm2060_vm6, %v2127_v2  ;;  %2449 = vst.msk [vmem:[%s3746_s5 + $0x70] sm:$0xff] %vm2060_vm6, %v2125_v4 }
 0x1e2   : > { %v2131_v24 = vpop.permute.xlu0 %2130  ;;  %v2129_v30 = vpop.permute.xlu1 %2128 }
 0x1e3   : > { %2452 = vst.msk [vmem:[%s3746_s5 + $0x98] sm:$0xff] %vm2060_vm6, %v2131_v24  ;;  %2451 = vst.msk [vmem:[%s3746_s5 + $0x90] sm:$0xff] %vm2060_vm6, %v2129_v30 }
 0x1e6   : > { %v2135_v31 = vpop.permute.xlu0 %2134  ;;  %v2133_v38 = vpop.permute.xlu1 %2132 }
 0x1e7   : > { %2454 = vst.msk [vmem:[%s3746_s5 + $0xb8] sm:$0xff] %vm2060_vm6, %v2135_v31  ;;  %2453 = vst.msk [vmem:[%s3746_s5 + $0xb0] sm:$0xff] %vm2060_vm6, %v2133_v38 }
 0x1ea   : > { %v2139_v43 = vpop.permute.xlu0 %2138  ;;  %v2137_v49 = vpop.permute.xlu1 %2136 }
 0x1eb   : > { %2456 = vst.msk [vmem:[%s3746_s5 + $0xd8] sm:$0xff] %vm2060_vm6, %v2139_v43  ;;  %2455 = vst.msk [vmem:[%s3746_s5 + $0xd0] sm:$0xff] %vm2060_vm6, %v2137_v49 }
 0x1ee   : > { %v2143_v50 = vpop.permute.xlu0 %2142  ;;  %v2141_v55 = vpop.permute.xlu1 %2140 }
 0x1ef   : > { %2458 = vst.msk [vmem:[%s3746_s5 + $0xf8] sm:$0xff] %vm2060_vm6, %v2143_v50  ;;  %2457 = vst.msk [vmem:[%s3746_s5 + $0xf0] sm:$0xff] %vm2060_vm6, %v2141_v55 }
 0x1f0 PF: > { %s13_s16 = sadd.s32 1, %s3060_s16   ;;  %s3879_s12 = smov %s3052_s14 }
 0x1f1   : > { %p10_p7 = scmp.ge.s32.totalorder %s13_s16, 6   ;;  %s3880_s13 = smov %s3056_s15 }
 0x1f2   : > { %s3881_s14 = smov %s3884_s17  ;;  %s3882_s15 = smov %s3888_s18 }
 0x1f3   :  { %12 = sbr.rel (!%p10_p7) target bundleno = 3 (0x3), region = 72 }

</bundles_post_ra>
